<compile_context>
chip_gen: v7x
topology: tpu7x:2x2x1
jax: 0.10.0
libtpu: 0.0.40
codegen_flags: <defaults>
</compile_context>

<pallas_src>
import jax
import jax.numpy as jnp
from jax.experimental import pallas as pl
from jax.experimental.pallas import tpu as pltpu


def _pool_head_kernel(x_ref, w_ref, b_ref, o_ref):
    # x_ref: [TB, C, HW]  feature-map tile (VMEM), channels-second (native NCHW)
    # w_ref: [C, Npad]    head weight, transposed and pre-scaled by 1/HW (VMEM)
    # b_ref: [1, Npad]    head bias, zero-padded (VMEM)
    # o_ref: [TB, Npad]   logits tile (VMEM, lane-dense)
    # AdaptiveAvgPool2d(1): the 1/HW scale lives in w_ref, so an fp32 sum
    # over the spatial (lane) axis is enough.  XLU reduce; accumulate in f32
    # even if the features arrive as bf16.
    pooled = jnp.sum(x_ref[...], axis=-1, dtype=jnp.float32)      # [TB, C]
    logits = jnp.dot(pooled, w_ref[...],
                     preferred_element_type=jnp.float32)          # MXU
    o_ref[...] = (logits + b_ref[...]).astype(o_ref.dtype)


def _pick_batch_tile(batch, c, hw, itemsize, target_bytes=4 * 1024 * 1024):
    """Largest multiple-of-8 batch tile whose input slab stays ~target_bytes."""
    per_row = c * hw * itemsize
    tb = max(8, (target_bytes // max(per_row, 1)) // 8 * 8)
    b_pad8 = ((batch + 7) // 8) * 8
    return min(tb, max(8, b_pad8))


def model_head_forward(features_nchw, head_w, head_b):
    """features_nchw: [B, C, H, W]  backbone feature map (NCHW, like PyTorch)
       head_w:        [num_classes, C]  torch.nn.Linear weight convention
       head_b:        [num_classes]
       returns:       [B, num_classes] logits (float32)
    """
    B, C, H, W = features_nchw.shape
    HW = H * W
    N = head_w.shape[0]
    Npad = max(128, ((N + 127) // 128) * 128)

    # Free contiguous reshape; NO transpose -> feature map read once from HBM.
    x = features_nchw.reshape(B, C, HW)
    itemsize = jnp.dtype(x.dtype).itemsize

    tb = _pick_batch_tile(B, C, HW, itemsize)
    B_pad = ((B + tb - 1) // tb) * tb
    if B_pad != B:
        x = jnp.pad(x, ((0, B_pad - B), (0, 0), (0, 0)))

    # Head params in lane-dense layout; pooling scale folded into the weight.
    # (In a real deployment these are prepared once at param-load time.)
    w_scaled = jnp.zeros((C, Npad), jnp.float32).at[:, :N].set(
        head_w.T.astype(jnp.float32) * (1.0 / HW))
    b_pad = jnp.zeros((1, Npad), jnp.float32).at[0, :N].set(
        head_b.astype(jnp.float32))

    # VMEM budget: 2x double-buffered input tile + resident weight/bias +
    # double-buffered output tile.  Only raise the scoped-VMEM limit when the
    # default (16 MiB on v5e) would not fit.
    in_tile_bytes = tb * C * HW * itemsize
    vmem_need = (2 * in_tile_bytes + 2 * C * Npad * 4 +
                 2 * tb * Npad * 4 + 2 * Npad * 4)
    compiler_kwargs = dict(dimension_semantics=("parallel",))
    if vmem_need > (16 << 20):
        compiler_kwargs["vmem_limit_bytes"] = min(int(vmem_need * 1.25), 48 << 20)

    # Advisory cost hint for XLA's scheduler around the custom call.
    cost = pl.CostEstimate(
        flops=int(2 * B_pad * C * Npad + B_pad * C * HW),
        transcendentals=0,
        bytes_accessed=int(B_pad * C * HW * itemsize
                           + C * Npad * 4 + Npad * 4 + B_pad * Npad * 4),
    )

    out = pl.pallas_call(
        _pool_head_kernel,
        out_shape=jax.ShapeDtypeStruct((B_pad, Npad), jnp.float32),
        grid_spec=pltpu.PrefetchScalarGridSpec(
            num_scalar_prefetch=0,
            grid=(B_pad // tb,),
            in_specs=[
                # last two block dims equal full array dims -> (8,128) rule ok
                pl.BlockSpec((tb, C, HW), lambda i: (i, 0, 0)),
                pl.BlockSpec((C, Npad), lambda i: (0, 0)),
                pl.BlockSpec((1, Npad), lambda i: (0, 0)),
            ],
            out_specs=pl.BlockSpec((tb, Npad), lambda i: (i, 0)),
        ),
        compiler_params=pltpu.CompilerParams(**compiler_kwargs),
        cost_estimate=cost,
    )(x, w_scaled, b_pad)

    return out[:B, :N]


if __name__ == "__main__":
    # Small shapes consistent with the module's forward:
    #   backbone feature map: batch=2, in_features=32 channels, 8x8 spatial
    #   head: Linear(in_features=32, num_classes=1)
    B, C, H, W, NUM_CLASSES = 2, 32, 8, 8, 1

    key = jax.random.PRNGKey(0)
    k_feat, k_w, k_b = jax.random.split(key, 3)

    features = jax.random.normal(k_feat, (B, C, H, W), dtype=jnp.float32)
    head_w = jax.random.normal(k_w, (NUM_CLASSES, C), dtype=jnp.float32) * 0.02
    head_b = jax.random.normal(k_b, (NUM_CLASSES,), dtype=jnp.float32) * 0.02

    out = model_head_forward(features, head_w, head_b)
    out = jax.block_until_ready(out)

    # Pure-JAX reference of the module-owned compute (pool + flatten + linear)
    ref = jnp.mean(features, axis=(2, 3)) @ head_w.T + head_b
    assert out.shape == (B, NUM_CLASSES)
    assert jnp.allclose(out, ref, atol=1e-5, rtol=1e-5)

    print("KERNEL_OK")
</pallas_src>

<mosaic_0001>
module attributes {stable_mosaic.version = 11 : i64} {
  func.func @_pool_head_kernel(%arg0: i32, %arg1: memref<8x32x64xf32, #tpu.memory_space<vmem>>, %arg2: memref<32x128xf32, #tpu.memory_space<vmem>>, %arg3: memref<1x128xf32, #tpu.memory_space<vmem>>, %arg4: memref<8x128xf32, #tpu.memory_space<vmem>>) attributes {dimension_semantics = [#tpu.dimension_semantics<parallel>], iteration_bounds = array<i64: 1>, scalar_prefetch = 0 : i64, scratch_operands = 0 : i64, tpu.core_type = #tpu.core_type<tc>, window_params = [{transform_indices = @transform_0, window_bounds = array<i64: 8, 32, 64>}, {pipeline_mode = #tpu.pipeline_mode<synchronous>, transform_indices = @transform_1, window_bounds = array<i64: 32, 128>}, {pipeline_mode = #tpu.pipeline_mode<synchronous>, transform_indices = @transform_2, window_bounds = array<i64: 1, 128>}, {transform_indices = @transform_3, window_bounds = array<i64: 8, 128>}]} {
    %c0 = arith.constant 0 : index
    %c0_0 = arith.constant 0 : index
    %c0_1 = arith.constant 0 : index
    %0 = vector.load %arg1[%c0, %c0_0, %c0_1] : memref<8x32x64xf32, #tpu.memory_space<vmem>>, vector<8x32x64xf32>
    %cst = arith.constant dense<0.000000e+00> : vector<8x32xf32>
    %1 = vector.multi_reduction <add>, %0, %cst [2] : vector<8x32x64xf32> to vector<8x32xf32>
    %c0_2 = arith.constant 0 : index
    %c0_3 = arith.constant 0 : index
    %2 = vector.load %arg2[%c0_2, %c0_3] : memref<32x128xf32, #tpu.memory_space<vmem>>, vector<32x128xf32>
    %cst_4 = arith.constant dense<0.000000e+00> : vector<8x128xf32>
    %3 = tpu.matmul %1, %2, %cst_4 {dimension_numbers = #tpu.dot_dimension_numbers<[1], [0], [0], [1], [0, 0, 1, 1], [], []>} : vector<8x32xf32>, vector<32x128xf32>, vector<8x128xf32> -> vector<8x128xf32>
    %c0_5 = arith.constant 0 : index
    %c0_6 = arith.constant 0 : index
    %4 = vector.load %arg3[%c0_5, %c0_6] : memref<1x128xf32, #tpu.memory_space<vmem>>, vector<1x128xf32>
    %5 = vector.broadcast %4 : vector<1x128xf32> to vector<8x128xf32>
    %6 = arith.addf %3, %5 : vector<8x128xf32>
    %c0_7 = arith.constant 0 : index
    %c0_8 = arith.constant 0 : index
    %7 = vector.load %arg4[%c0_7, %c0_8] : memref<8x128xf32, #tpu.memory_space<vmem>>, vector<8x128xf32>
    tpu.vector_store %arg4[%c0_7, %c0_8], %6 {strides = array<i32>} : memref<8x128xf32, #tpu.memory_space<vmem>>, vector<8x128xf32>,
    return
  }
  func.func @transform_0(%arg0: i32) -> (i32, i32, i32) {
    %c0_i32 = arith.constant 0 : i32
    %c0_i32_0 = arith.constant 0 : i32
    %c0_i32_1 = arith.constant 0 : i32
    return %arg0, %c0_i32, %c0_i32_0 : i32, i32, i32
  }
  func.func @transform_1(%arg0: i32) -> (i32, i32) {
    %c0_i32 = arith.constant 0 : i32
    %c0_i32_0 = arith.constant 0 : i32
    %c0_i32_1 = arith.constant 0 : i32
    return %c0_i32, %c0_i32_0 : i32, i32
  }
  func.func @transform_2(%arg0: i32) -> (i32, i32) {
    %c0_i32 = arith.constant 0 : i32
    %c0_i32_0 = arith.constant 0 : i32
    %c0_i32_1 = arith.constant 0 : i32
    return %c0_i32, %c0_i32_0 : i32, i32
  }
  func.func @transform_3(%arg0: i32) -> (i32, i32) {
    %c0_i32 = arith.constant 0 : i32
    %c0_i32_0 = arith.constant 0 : i32
    return %arg0, %c0_i32 : i32, i32
  }
}

</mosaic_0001>

<bundles_post_ra>
// kernel: tpu_custom_call.1
= control target key start
LH: loop header
LB: loop body
LE: loop exit
PB: predicated region body
PF: predicated region fallthrough
CT: control target
= control target key end

     0   :  { %8 = vsyncpa [#allocation3], 0  ;;  %s788_s0 = inlined_call_operand.hbm [shape: f32[8,32,64], index: 0, kind: input, shape index: {}]   ;;  %s789_s1 = inlined_call_operand.hbm [shape: f32[32,128], index: 1, kind: input, shape index: {}]   ;;  %s790_s2 = inlined_call_operand.vmem [shape: f32[1,128], index: 2, kind: input, shape index: {}]   ;;  %s791_s3 = inlined_call_operand.hbm [shape: f32[8,128], index: 3, kind: output, shape index: {}]  }
   0x1   :  { %9 = vsyncpa [#allocation6], 0 }
   0x2   :  { %10 = vsyncpa [#allocation4], 0  ;;  %s583_s12 = smov [#allocation2]   ;;  %s511_s16 = scalar_lea.hbm %s788_s0, 4096 }
   0x3   :  { %s16_s13 = sshll.u32 %s583_s12, 4  ;;  %p512_p0 = scmp.ne.s32.totalorder %s788_s0, %s511_s16  ;;  %s17_s13 = int_to_ptr.vmem [resolvable:$true] %s16_s13 }
   0x4   :  { %p515_p1 = scmp.lt.u32.totalorder %s511_s16, %s788_s0 }
   0x6   :  { %p517_p2 = pnand %p515_p1, %p512_p0 }
   0x8   :  { %520 = shalt.err (!%p517_p2)
}
   0x9   :  { %s521_s21 = scalar_lea.vmem %s17_s13, 4096  ;;  %p526_p4 = scmp.lt.s32.totalorder %s17_s13, %s17_s13 }
   0xa   :  { %p522_p3 = scmp.ne.s32.totalorder %s17_s13, %s521_s21  ;;  %p527_p5 = scmp.lt.s32.totalorder %s521_s21, %s521_s21 }
   0xc   :  { %p528_p6 = por %p527_p5, %p526_p4 }
   0xe   :  { %p529_p7 = pnand %p528_p6, %p522_p3 }
  0x10   :  { %532 = shalt.err (!%p529_p7)
}
  0x11   :  { %s584_s22 = smov 128   ;;  %s585_s23 = smov 8  }
  0x12   :  { %22 = dma.hbm_to_vmem [thread:$0]  %s788_s0, 4096, %s17_s13, [#allocation3], %s584_s22, %s584_s22, %s585_s23  }
  0x13   :  { %s586_s26 = smov [#allocation5]   ;;  %s533_s30 = scalar_lea.hbm %s789_s1, 512 }
  0x14   :  { %s28_s27 = sshll.u32 %s586_s26, 4  ;;  %p534_p8 = scmp.ne.s32.totalorder %s789_s1, %s533_s30  ;;  %s29_s27 = int_to_ptr.vmem [resolvable:$true] %s28_s27 }
  0x15   :  { %p537_p9 = scmp.lt.u32.totalorder %s533_s30, %s789_s1 }
  0x17   :  { %p539_p10 = pnand %p537_p9, %p534_p8 }
  0x19   :  { %542 = shalt.err (!%p539_p10)
}
  0x1a   :  { %s543_s8 = scalar_lea.vmem %s29_s27, 512  ;;  %p548_p12 = scmp.lt.s32.totalorder %s29_s27, %s29_s27 }
  0x1b   :  { %p544_p11 = scmp.ne.s32.totalorder %s29_s27, %s543_s8  ;;  %p549_p13 = scmp.lt.s32.totalorder %s543_s8, %s543_s8 }
  0x1d   :  { %p550_p0 = por %p549_p13, %p548_p12 }
  0x1f   :  { %p551_p1 = pnand %p550_p0, %p544_p11 }
  0x21   :  { %554 = shalt.err (!%p551_p1)
}
  0x22   :  { %34 = dma.hbm_to_vmem [thread:$0]  %s789_s1, 512, %s29_s27, [#allocation6], %s584_s22, %s584_s22, %s585_s23  }
  0x23   :  { %577 = dma.done.wait [#allocation3], 4096  }
  0x24   :  { %578 = vsyncadd [#allocation3], 4294963200 }
  0x25   :  { %579 = dma.done.wait [#allocation6], 512  }
  0x26   :  { %580 = vsyncadd [#allocation6], 4294966784  ;;  %vm75_vm0 = vcmask 523264   ;;  %v47_v0 = vld [vmem:[#allocation2 + $0x20] sm:$0xff]  ;;  %v48_v2 = vld [vmem:[#allocation2 + $0x28] sm:$0xff]  ;;  %vm588_vm1 = vmmov 0  }
  0x27   :  { %v43_v1 = vld [vmem:[#allocation2] sm:$0xff]  ;;  %v88_v3 = vsel %vm75_vm0, %v47_v0, 0.0  ;;  %v44_v5 = vld [vmem:[#allocation2 + $0x8] sm:$0xff]  ;;  %v91_v6 = vsel %vm75_vm0, %v48_v2, 0.0  ;;  %v49_v8 = vld [vmem:[#allocation2 + $0x30] sm:$0xff]  ;;  %vm226_vm2 = vcmask 130112  }
  0x28   :  { %v76_v4 = vsel %vm75_vm0, %v43_v1, 0.0  ;;  %89 = vadd.xlane.f32.xlu1 %v88_v3  ;;  %v79_v7 = vsel %vm75_vm0, %v44_v5, 0.0  ;;  %v45_v9 = vld [vmem:[#allocation2 + $0x10] sm:$0xff]  ;;  %v94_v10 = vsel %vm75_vm0, %v49_v8, 0.0  ;;  %v52_v12 = vld [vmem:[#allocation2 + $0x48] sm:$0xff]  ;;  %v51_v13 = vld [vmem:[#allocation2 + $0x40] sm:$0xff] }
  0x29   :  { %77 = vadd.xlane.f32.xlu0 %v76_v4  ;;  %v82_v11 = vsel %vm75_vm0, %v45_v9, 0.0  ;;  %v103_v14 = vsel %vm75_vm0, %v52_v12, 0.0  ;;  %v100_v15 = vsel %vm75_vm0, %v51_v13, 0.0  ;;  %v50_v16 = vld [vmem:[#allocation2 + $0x38] sm:$0xff]  ;;  %v55_v20 = vld [vmem:[#allocation2 + $0x60] sm:$0xff]  ;;  %v53_v21 = vld [vmem:[#allocation2 + $0x50] sm:$0xff] }
  0x2a   :  { %v46_v17 = vld [vmem:[#allocation2 + $0x18] sm:$0xff]  ;;  %v97_v18 = vsel %vm75_vm0, %v50_v16, 0.0  ;;  %v112_v22 = vsel %vm75_vm0, %v55_v20, 0.0  ;;  %v106_v23 = vsel %vm75_vm0, %v53_v21, 0.0  ;;  %v56_v25 = vld [vmem:[#allocation2 + $0x68] sm:$0xff]  ;;  %v59_v28 = vld [vmem:[#allocation2 + $0x80] sm:$0xff] }
  0x2b   :  { %v85_v19 = vsel %vm75_vm0, %v46_v17, 0.0  ;;  %v54_v24 = vld [vmem:[#allocation2 + $0x58] sm:$0xff]  ;;  %v115_v27 = vsel %vm75_vm0, %v56_v25, 0.0  ;;  %v57_v29 = vld [vmem:[#allocation2 + $0x70] sm:$0xff]  ;;  %v124_v30 = vsel %vm75_vm0, %v59_v28, 0.0  ;;  %v60_v33 = vld [vmem:[#allocation2 + $0x88] sm:$0xff] }
  0x2c   :  { %92 = vadd.xlane.f32.xlu1 %v91_v6  ;;  %v109_v26 = vsel %vm75_vm0, %v54_v24, 0.0  ;;  %v118_v31 = vsel %vm75_vm0, %v57_v29, 0.0  ;;  %v58_v32 = vld [vmem:[#allocation2 + $0x78] sm:$0xff]  ;;  %v127_v35 = vsel %vm75_vm0, %v60_v33, 0.0  ;;  %v63_v36 = vld [vmem:[#allocation2 + $0xa0] sm:$0xff]  ;;  %v61_v37 = vld [vmem:[#allocation2 + $0x90] sm:$0xff]  ;;  %v215_v24 = vlaneseq }
  0x2d   :  { %80 = vadd.xlane.f32.xlu0 %v79_v7  ;;  %v121_v34 = vsel %vm75_vm0, %v58_v32, 0.0  ;;  %v136_v38 = vsel %vm75_vm0, %v63_v36, 0.0  ;;  %v130_v39 = vsel %vm75_vm0, %v61_v37, 0.0  ;;  %v62_v40 = vld [vmem:[#allocation2 + $0x98] sm:$0xff]  ;;  %v64_v41 = vld [vmem:[#allocation2 + $0xa8] sm:$0xff]  ;;  %v67_v44 = vld [vmem:[#allocation2 + $0xc0] sm:$0xff] }
  0x2e   :  { %v133_v42 = vsel %vm75_vm0, %v62_v40, 0.0  ;;  %v139_v43 = vsel %vm75_vm0, %v64_v41, 0.0  ;;  %v65_v45 = vld [vmem:[#allocation2 + $0xb0] sm:$0xff]  ;;  %v148_v46 = vsel %vm75_vm0, %v67_v44, 0.0  ;;  %v66_v48 = vld [vmem:[#allocation2 + $0xb8] sm:$0xff]  ;;  %v68_v49 = vld [vmem:[#allocation2 + $0xc8] sm:$0xff] }
  0x2f   :  { %v142_v47 = vsel %vm75_vm0, %v65_v45, 0.0  ;;  %v145_v50 = vsel %vm75_vm0, %v66_v48, 0.0  ;;  %v151_v51 = vsel %vm75_vm0, %v68_v49, 0.0  ;;  %v71_v52 = vld [vmem:[#allocation2 + $0xe0] sm:$0xff]  ;;  %v69_v53 = vld [vmem:[#allocation2 + $0xd0] sm:$0xff]  ;;  %v70_v56 = vld [vmem:[#allocation2 + $0xd8] sm:$0xff] }
  0x30   :  { %95 = vadd.xlane.f32.xlu1 %v94_v10  ;;  %v160_v54 = vsel %vm75_vm0, %v71_v52, 0.0  ;;  %v154_v55 = vsel %vm75_vm0, %v69_v53, 0.0  ;;  %v72_v57 = vld [vmem:[#allocation2 + $0xe8] sm:$0xff]  ;;  %v157_v58 = vsel %vm75_vm0, %v70_v56, 0.0  ;;  %v73_v60 = vld [vmem:[#allocation2 + $0xf0] sm:$0xff]  ;;  %v74_v61 = vld [vmem:[#allocation2 + $0xf8] sm:$0xff] }
  0x31   :  { %83 = vadd.xlane.f32.xlu0 %v82_v11  ;;  %v163_v59 = vsel %vm75_vm0, %v72_v57, 0.0  ;;  %v166_v62 = vsel %vm75_vm0, %v73_v60, 0.0  ;;  %v169_v63 = vsel %vm75_vm0, %v74_v61, 0.0  ;;  %v172_v0 = vld [vmem:[#allocation5] sm:$0xff]  ;;  %v173_v1 = vld [vmem:[#allocation5 + $0x8] sm:$0xff]  ;;  %v587_v3 = vmov 0.0|0.0  }
  0x32   :  { %v498_v2 = vpack.c.bf16 %v173_v1, %v172_v0  ;;  %497 = vmatprep.subr.bf16.mxu0 %v587_v3  ;;  %v174_v4 = vld [vmem:[#allocation5 + $0x10] sm:$0xff]  ;;  %v175_v5 = vld [vmem:[#allocation5 + $0x18] sm:$0xff]  ;;  %v589_v7 = vmov 0.0   ;;  %vm233_vm3 = vcmask 195712   ;;  %vm240_vm4 = vcmask 261312   ;;  %s590_s11 = smov [#allocation7]  }
  0x33   :  { %v501_v6 = vpack.c.bf16 %v175_v5, %v174_v4  ;;  %494 = vmatprep.mubr.msk.f32.mxu0 %vm588_vm1, %v589_v7  ;;  %vm375_vm5 = vcmask 1041409   ;;  %vm377_vm6 = vcmask 1042434   ;;  %vm379_vm7 = vcmask 1043459   ;;  %s469_s12 = sshll.u32 %s590_s11, 4  ;;  %s470_s12 = int_to_ptr.vmem [resolvable:$true] %s469_s12 }
  0x34   :  { %104 = vadd.xlane.f32.xlu1 %v103_v14  ;;  %499 = vmatpush3.bf16.msra.mxu0 %v498_v2  ;;  %vm381_vm8 = vcmask 1044484   ;;  %vm383_vm9 = vcmask 1045509   ;;  %vm385_vm10 = vcmask 1046534   ;;  %vm387_vm11 = vcmask 1047559   ;;  %s555_s13 = scalar_lea.vmem %s470_s12, 128  ;;  %p560_p3 = scmp.lt.s32.totalorder %s470_s12, %s470_s12 }
  0x35   :  { %101 = vadd.xlane.f32.xlu0 %v100_v15  ;;  %500 = vmatprep.subr.bf16.mxu0 %v587_v3  ;;  %vm389_vm12 = vcmask 261120   ;;  %p556_p2 = scmp.ne.s32.totalorder %s470_s12, %s555_s13  ;;  %p561_p4 = scmp.lt.s32.totalorder %s555_s13, %s555_s13 }
  0x37   :  { %p562_p5 = por %p561_p4, %p560_p3 }
  0x38   :  { %98 = vadd.xlane.f32.xlu1 %v97_v18  ;;  %502 = vmatpush3.bf16.msra.mxu0 %v501_v6 }
  0x39   :  { %86 = vadd.xlane.f32.xlu0 %v85_v19  ;;  %p563_p6 = pnand %p562_p5, %p556_p2 }
  0x3c   :  { %113 = vadd.xlane.f32.xlu1 %v112_v22 }
  0x3d   :  { %107 = vadd.xlane.f32.xlu0 %v106_v23 }
  0x40   :  { %110 = vadd.xlane.f32.xlu1 %v109_v26 }
  0x41   :  { %116 = vadd.xlane.f32.xlu0 %v115_v27  ;;  %v216_v27 = vand.u32 127, %v215_v24 }
  0x43   :  { %v228_v32 = vadd.s32 4294967280, %v216_v27  ;;  %v235_v33 = vadd.s32 4294967272, %v216_v27 }
  0x44   :  { %125 = vadd.xlane.f32.xlu1 %v124_v30  ;;  %v221_v30 = vadd.s32 4294967288, %v216_v27 }
  0x45   :  { %119 = vadd.xlane.f32.xlu0 %v118_v31  ;;  %v218_v31 = vshrl.u32 %v215_v24, 7 }
  0x47   :  { %v687_v36 = vsub.s32 %v221_v30, %v218_v31  ;;  %v689_v37 = vsub.s32 %v216_v27, %v218_v31 }
  0x48   :  { %122 = vadd.xlane.f32.xlu1 %v121_v34 }
  0x49   :  { %128 = vadd.xlane.f32.xlu0 %v127_v35 }
  0x4c   :  { %137 = vadd.xlane.f32.xlu1 %v136_v38  ;;  %v691_v38 = vsub.s32 %v228_v32, %v218_v31 }
  0x4d   :  { %131 = vadd.xlane.f32.xlu0 %v130_v39  ;;  %v693_v39 = vsub.s32 %v235_v33, %v218_v31 }
  0x50   :  { %134 = vadd.xlane.f32.xlu1 %v133_v42 }
  0x51   :  { %140 = vadd.xlane.f32.xlu0 %v139_v43 }
  0x54   :  { %149 = vadd.xlane.f32.xlu1 %v148_v46 }
  0x55   :  { %143 = vadd.xlane.f32.xlu0 %v142_v47 }
  0x58   :  { %146 = vadd.xlane.f32.xlu1 %v145_v50 }
  0x59   :  { %152 = vadd.xlane.f32.xlu0 %v151_v51 }
  0x5c   :  { %161 = vadd.xlane.f32.xlu1 %v160_v54 }
  0x5d   :  { %155 = vadd.xlane.f32.xlu0 %v154_v55 }
  0x60   :  { %158 = vadd.xlane.f32.xlu1 %v157_v58 }
  0x61   :  { %164 = vadd.xlane.f32.xlu0 %v163_v59 }
  0x64   :  { %170 = vadd.xlane.f32.xlu1 %v169_v63 }
  0x65   :  { %167 = vadd.xlane.f32.xlu0 %v166_v62 }
  0xb5   :  { %v90_v8 = vpop.xlane.xlu1 %89 }
  0xb6   :  { %v78_v9 = vpop.xlane.xlu0 %77  ;;  %v245_v44 = vrot.slane %v90_v8, %v689_v37 }
  0xb7   :  { %v220_v45 = vrot.slane %v78_v9, %v689_v37 }
  0xb9   :  { %v93_v10 = vpop.xlane.xlu1 %92 }
  0xba   :  { %v81_v11 = vpop.xlane.xlu0 %80  ;;  %v249_v42 = vrot.slane %v93_v10, %v687_v36 }
  0xbb   :  { %v225_v43 = vrot.slane %v81_v11, %v687_v36 }
  0xbc   :  { %v250_v55 = vsel %vm226_vm2, %v249_v42, %v245_v44 }
  0xbd   :  { %v96_v12 = vpop.xlane.xlu1 %95  ;;  %v227_v56 = vsel %vm226_vm2, %v225_v43, %v220_v45 }
  0xbe   :  { %v84_v13 = vpop.xlane.xlu0 %83  ;;  %v254_v46 = vrot.slane %v96_v12, %v691_v38 }
  0xbf   :  { %v232_v47 = vrot.slane %v84_v13, %v691_v38 }
  0xc0   :  { %v255_v58 = vsel %vm233_vm3, %v254_v46, %v250_v55 }
  0xc1   :  { %v105_v14 = vpop.xlane.xlu1 %104  ;;  %v234_v59 = vsel %vm233_vm3, %v232_v47, %v227_v56 }
  0xc2   :  { %v102_v15 = vpop.xlane.xlu0 %101  ;;  %v268_v48 = vrot.slane %v105_v14, %v687_v36 }
  0xc3   :  { %v264_v49 = vrot.slane %v102_v15, %v689_v37 }
  0xc5   :  { %v99_v16 = vpop.xlane.xlu1 %98  ;;  %v269_v60 = vsel %vm226_vm2, %v268_v48, %v264_v49 }
  0xc6   :  { %v87_v17 = vpop.xlane.xlu0 %86  ;;  %v259_v50 = vrot.slane %v99_v16, %v693_v39 }
  0xc7   :  { %v239_v51 = vrot.slane %v87_v17, %v693_v39 }
  0xc8   :  { %v260_v61 = vsel %vm240_vm4, %v259_v50, %v255_v58 }
  0xc9   :  { %v667_v18 = vpop.xlane.xlu1 %113  ;;  %v241_v62 = vsel %vm240_vm4, %v239_v51, %v234_v59 }
  0xca   :  { %v108_v19 = vpop.xlane.xlu0 %107  ;;  %v283_v2 = vrot.slane %v667_v18, %v689_v37 }
  0xcb   :  { %v273_v54 = vrot.slane %v108_v19, %v691_v38 }
  0xcd   :  { %v111_v20 = vpop.xlane.xlu1 %110  ;;  %v274_v3 = vsel %vm233_vm3, %v273_v54, %v269_v60 }
  0xce   :  { %v669_v21 = vpop.xlane.xlu0 %116  ;;  %v278_v57 = vrot.slane %v111_v20, %v693_v39 }
  0xcf   :  { %v287_v63 = vrot.slane %v669_v21, %v687_v36 }
  0xd0   :  { %v279_v6 = vsel %vm240_vm4, %v278_v57, %v274_v3 }
  0xd1   :  { %v671_v22 = vpop.xlane.xlu1 %125  ;;  %v288_v14 = vsel %vm226_vm2, %v287_v63, %v283_v2 }
  0xd2   :  { %v673_v23 = vpop.xlane.xlu0 %119  ;;  %v302_v10 = vrot.slane %v671_v22, %v689_v37 }
  0xd3   :  { %v292_v4 = vrot.slane %v673_v23, %v691_v38 }
  0xd5   :  { %v675_v25 = vpop.xlane.xlu1 %122  ;;  %v293_v20 = vsel %vm233_vm3, %v292_v4, %v288_v14 }
  0xd6   :  { %v677_v26 = vpop.xlane.xlu0 %128  ;;  %v297_v7 = vrot.slane %v675_v25, %v693_v39 }
  0xd7   :  { %v306_v5 = vrot.slane %v677_v26, %v687_v36 }
  0xd8   :  { %v298_v24 = vsel %vm240_vm4, %v297_v7, %v293_v20 }
  0xd9   :  { %v679_v28 = vpop.xlane.xlu1 %137  ;;  %v307_v21 = vsel %vm226_vm2, %v306_v5, %v302_v10 }
  0xda   :  { %v681_v29 = vpop.xlane.xlu0 %131  ;;  %v321_v15 = vrot.slane %v679_v28, %v689_v37  ;;  %v376_v28 = vsel %vm375_vm5, %v260_v61, %v241_v62 }
  0xdb   :  { %v311_v8 = vrot.slane %v681_v29, %v691_v38  ;;  %v378_v32 = vsel %vm377_vm6, %v279_v6, %v376_v28 }
  0xdd   :  { %v683_v34 = vpop.xlane.xlu1 %134  ;;  %v312_v25 = vsel %vm233_vm3, %v311_v8, %v307_v21 }
  0xde   :  { %v685_v35 = vpop.xlane.xlu0 %140  ;;  %v316_v11 = vrot.slane %v683_v34, %v693_v39 }
  0xdf   :  { %v325_v9 = vrot.slane %v685_v35, %v687_v36 }
  0xe0   :  { %v317_v29 = vsel %vm240_vm4, %v316_v11, %v312_v25 }
  0xe1   :  { %v695_v40 = vpop.xlane.xlu1 %149  ;;  %v326_v26 = vsel %vm226_vm2, %v325_v9, %v321_v15 }
  0xe2   :  { %v697_v41 = vpop.xlane.xlu0 %143  ;;  %v340_v22 = vrot.slane %v695_v40, %v689_v37 }
  0xe3   :  { %v330_v12 = vrot.slane %v697_v41, %v691_v38 }
  0xe5   :  { %v147_v52 = vpop.xlane.xlu1 %146  ;;  %v331_v30 = vsel %vm233_vm3, %v330_v12, %v326_v26 }
  0xe6   :  { %v153_v53 = vpop.xlane.xlu0 %152  ;;  %v335_v16 = vrot.slane %v147_v52, %v693_v39 }
  0xe7   :  { %v344_v13 = vrot.slane %v153_v53, %v687_v36 }
  0xe8   :  { %v336_v33 = vsel %vm240_vm4, %v335_v16, %v331_v30 }
  0xe9   :  { %v162_v0 = vpop.xlane.xlu1 %161  ;;  %v345_v31 = vsel %vm226_vm2, %v344_v13, %v340_v22 }
  0xea   :  { %v156_v1 = vpop.xlane.xlu0 %155  ;;  %v359_v34 = vrot.slane %v162_v0, %v689_v37 }
  0xeb   :  { %v349_v17 = vrot.slane %v156_v1, %v691_v38 }
  0xed   :  { %v159_v18 = vpop.xlane.xlu1 %158  ;;  %v350_v35 = vsel %vm233_vm3, %v349_v17, %v345_v31 }
  0xee   :  { %v165_v19 = vpop.xlane.xlu0 %164  ;;  %v354_v23 = vrot.slane %v159_v18, %v693_v39 }
  0xef   :  { %v363_v27 = vrot.slane %v165_v19, %v687_v36  ;;  %v380_v36 = vsel %vm379_vm7, %v298_v24, %v378_v32 }
  0xf0   :  { %v355_v42 = vsel %vm240_vm4, %v354_v23, %v350_v35  ;;  %v382_v45 = vsel %vm381_vm8, %v317_v29, %v380_v36 }
  0xf1   :  { %v171_v41 = vpop.xlane.xlu1 %170  ;;  %v364_v46 = vsel %vm226_vm2, %v363_v27, %v359_v34  ;;  %v384_v47 = vsel %vm383_vm9, %v336_v33, %v382_v45 }
  0xf2   :  { %v168_v40 = vpop.xlane.xlu0 %167  ;;  %v373_v44 = vrot.slane %v171_v41, %v693_v39  ;;  %v386_v49 = vsel %vm385_vm10, %v355_v42, %v384_v47 }
  0xf3   :  { %v368_v43 = vrot.slane %v168_v40, %v691_v38  ;;  %v479_v38 = vld [vmem:[%s790_s2] ss:$0 sm:$0xff] }
  0xf5   :  { %v369_v37 = vsel %vm233_vm3, %v368_v43, %v364_v46 }
  0xf6   :  { %v374_v48 = vsel %vm240_vm4, %v373_v44, %v369_v37 }
  0xf7   :  { %v388_v50 = vsel %vm387_vm11, %v374_v48, %v386_v49 }
  0xf8   :  { %495 = vmatmul.mubr.msk.f32.vlgmr.msra.gmra.mrb[0].mxu0 %vm389_vm12, %v388_v50 }
 0x1cb   :  { %v458_v39 = vpop.f32.mrb[0].mxu0 }
 0x1cc   :  { %v459_v51 = vadd.f32 %v479_v38, %v458_v39  ;;  %v496_v52 = vpop.f32.mrb[1].mxu0 }
 0x1ce   :  { %462 = vst [vmem:[#allocation7] sm:$0xff] %v459_v51 }
 0x1cf   :  { %566 = shalt.err (!%p563_p6)
}
 0x1d0   :  { %s567_s16 = scalar_lea.hbm %s791_s3, 128 }
 0x1d1   :  { %p568_p7 = scmp.ne.s32.totalorder %s791_s3, %s567_s16  ;;  %p571_p8 = scmp.lt.u32.totalorder %s567_s16, %s791_s3 }
 0x1d3   :  { %p573_p9 = pnand %p571_p8, %p568_p7 }
 0x1d5   :  { %576 = shalt.err (!%p573_p9)
}
 0x1d6   :  { %472 = dma.vmem_to_hbm [thread:$0]  %s470_s12, 128, %s791_s3, [#allocation4]  }
 0x1d7   :  { %581 = dma.done.wait [#allocation4], 128  }
 0x1d8   :  { %582 = vsyncadd [#allocation4], 4294967168 }
 0x1d9   :  { %476 = vsyncpa [#allocation3], 1 }
 0x1da   :  { %477 = vsyncpa [#allocation6], 1 }
 0x1db   :  { %478 = vsyncpa [#allocation4], 1 }

</bundles_post_ra>
